<compile_context>
chip_gen: v5e
topology: v5e:2x2
jax: 0.10.0
libtpu: 0.0.40
codegen_flags: <defaults>
</compile_context>

<pallas_src>
import math

import jax
import jax.numpy as jnp
from jax.experimental import pallas as pl
from jax.experimental.pallas import tpu as pltpu


def _add_pe_kernel(x_ref, pe_ref, o_ref):
    # x_ref / o_ref: (tr, c) block of one batch element's flattened (R, C) plane.
    # pe_ref:        matching (tr, c) block of the positional-encoding slab.
    x = x_ref[...].astype(jnp.float32)
    p = pe_ref[...].astype(jnp.float32)
    o_ref[...] = (x + p).astype(o_ref.dtype)


def _sinusoidal_table(s, d):
    """Standard sinusoidal encoding, identical to the PyTorch buffer (f32)."""
    position = jnp.arange(s, dtype=jnp.float32)[:, None]
    div_term = jnp.exp(
        jnp.arange(0, d, 2, dtype=jnp.float32) * (-math.log(10000.0) / d)
    )
    ang = position * div_term                                    # (s, d//2)
    # even columns = sin, odd columns = cos
    return jnp.stack([jnp.sin(ang), jnp.cos(ang)], axis=-1).reshape(s, d)


def positional_encoding(x, *, dropout_p=0.1):
    """x: (B, S, D). Returns x + pe[:, :S, :] (dropout = eval-mode identity)."""
    del dropout_p  # identity at inference time
    b, s, d = x.shape
    if d % 2 != 0:
        raise ValueError("d_model must be even (matches the PyTorch module).")

    # --- lane-dense flat view: fold (S, D) into rows of C lanes -------------
    if d % 128 == 0:
        c = d                       # already lane-dense
    elif (s * d) % 128 == 0:
        c = 128                     # fold positions into 128-wide rows
    else:
        c = d                       # rare fallback: full last dim (legal block)
    r = (s * d) // c                # flat rows per batch element

    xr = x.reshape(b, r, c)
    pe = _sinusoidal_table(s, d).reshape(r, c).astype(x.dtype)

    # --- tile sizing ---------------------------------------------------------
    itemsize = jnp.dtype(x.dtype).itemsize
    row_mult = max(8, 32 // itemsize)            # 8 f32 / 16 bf16 / 32 int8
    target_rows = max(1, (4 << 20) // (c * itemsize))   # ~4 MiB per x buffer

    if r <= row_mult:
        tr = r                                   # single full-rows block
    else:
        tr = min(target_rows, r)
        tr = max(row_mult, (tr // row_mult) * row_mult)
        if r >= 2 * row_mult:
            # keep >= 2 row tiles so the "parallel" axis can feed both v7x TCs
            half = (((r + 1) // 2 + row_mult - 1) // row_mult) * row_mult
            tr = min(tr, half)
    n_row_tiles = pl.cdiv(r, tr)

    # 2 x-in bufs + 2 out bufs + 2 pe bufs (double-buffered) + slack.
    buf_bytes = tr * c * itemsize
    vmem_limit = max(16 << 20, min(6 * buf_bytes + (8 << 20), 48 << 20))

    out = pl.pallas_call(
        _add_pe_kernel,
        out_shape=jax.ShapeDtypeStruct((b, r, c), x.dtype),
        grid=(n_row_tiles, b),  # batch innermost: pe tile reused across batch
        in_specs=[
            pl.BlockSpec((None, tr, c), lambda i, j: (j, i, 0)),   # x
            pl.BlockSpec((tr, c), lambda i, j: (i, 0)),            # pe (batch-invariant)
        ],
        out_specs=pl.BlockSpec((None, tr, c), lambda i, j: (j, i, 0)),
        input_output_aliases={0: 0},  # in-place add when x is dead afterwards
        compiler_params=pltpu.CompilerParams(
            dimension_semantics=("parallel", "parallel"),
            vmem_limit_bytes=vmem_limit,
        ),
    )(xr, pe)
    return out.reshape(b, s, d)


def _reference(x):
    b, s, d = x.shape
    position = jnp.arange(s, dtype=jnp.float32)[:, None]
    div_term = jnp.exp(
        jnp.arange(0, d, 2, dtype=jnp.float32) * (-math.log(10000.0) / d)
    )
    pe = jnp.zeros((s, d), jnp.float32)
    pe = pe.at[:, 0::2].set(jnp.sin(position * div_term))
    pe = pe.at[:, 1::2].set(jnp.cos(position * div_term))
    return x + pe[None, :, :]


if __name__ == "__main__":
    key = jax.random.PRNGKey(0)
    B, S, D = 2, 8, 32  # batch, seq, d_model (small, consistent with module)
    x = jax.random.normal(key, (B, S, D), dtype=jnp.float32)

    out = jax.jit(positional_encoding)(x)
    out = jax.block_until_ready(out)

    ref = _reference(x)
    assert out.shape == (B, S, D)
    assert jnp.allclose(out, ref, atol=1e-5, rtol=1e-5)

    print("KERNEL_OK")
</pallas_src>

<mosaic_0001>
module attributes {stable_mosaic.version = 11 : i64} {
  func.func @_add_pe_kernel(%arg0: i32, %arg1: i32, %arg2: memref<1x2x128xf32, #tpu.memory_space<vmem>>, %arg3: memref<2x128xf32, #tpu.memory_space<vmem>>, %arg4: memref<1x2x128xf32, #tpu.memory_space<vmem>>) attributes {dimension_semantics = [#tpu.dimension_semantics<parallel>, #tpu.dimension_semantics<parallel>], iteration_bounds = array<i64: 1, 2>, scalar_prefetch = 0 : i64, scratch_operands = 0 : i64, tpu.core_type = #tpu.core_type<tc>, window_params = [{transform_indices = @transform_0, window_bounds = array<i64: 1, 2, 128>}, {transform_indices = @transform_1, window_bounds = array<i64: 2, 128>}, {transform_indices = @transform_2, window_bounds = array<i64: 1, 2, 128>}]} {
    %c0 = arith.constant 0 : index
    %c0_0 = arith.constant 0 : index
    %c0_1 = arith.constant 0 : index
    %0 = vector.load %arg2[%c0, %c0_0, %c0_1] : memref<1x2x128xf32, #tpu.memory_space<vmem>>, vector<1x2x128xf32>
    %1 = vector.shape_cast %0 : vector<1x2x128xf32> to vector<2x128xf32>
    %c0_2 = arith.constant 0 : index
    %c0_3 = arith.constant 0 : index
    %2 = vector.load %arg3[%c0_2, %c0_3] : memref<2x128xf32, #tpu.memory_space<vmem>>, vector<2x128xf32>
    %3 = arith.addf %1, %2 : vector<2x128xf32>
    %c0_4 = arith.constant 0 : index
    %c0_5 = arith.constant 0 : index
    %c0_6 = arith.constant 0 : index
    %4 = vector.load %arg4[%c0_4, %c0_5, %c0_6] : memref<1x2x128xf32, #tpu.memory_space<vmem>>, vector<1x2x128xf32>
    %5 = vector.shape_cast %4 : vector<1x2x128xf32> to vector<2x128xf32>
    %6 = vector.shape_cast %3 : vector<2x128xf32> to vector<1x2x128xf32>
    tpu.vector_store %arg4[%c0_4, %c0_5, %c0_6], %6 {strides = array<i32>} : memref<1x2x128xf32, #tpu.memory_space<vmem>>, vector<1x2x128xf32>,
    return
  }
  func.func @transform_0(%arg0: i32, %arg1: i32) -> (i32, i32, i32) {
    %c0_i32 = arith.constant 0 : i32
    %c0_i32_0 = arith.constant 0 : i32
    return %arg1, %arg0, %c0_i32 : i32, i32, i32
  }
  func.func @transform_1(%arg0: i32, %arg1: i32) -> (i32, i32) {
    %c0_i32 = arith.constant 0 : i32
    %c0_i32_0 = arith.constant 0 : i32
    return %arg0, %c0_i32 : i32, i32
  }
  func.func @transform_2(%arg0: i32, %arg1: i32) -> (i32, i32, i32) {
    %c0_i32 = arith.constant 0 : i32
    %c0_i32_0 = arith.constant 0 : i32
    return %arg1, %arg0, %c0_i32 : i32, i32, i32
  }
}

</mosaic_0001>

<bundles_post_ra>
// kernel: positional_encoding.1
= control target key start
LH: loop header
LB: loop body
LE: loop exit
PB: predicated region body
PF: predicated region fallthrough
CT: control target
= control target key end

     0   :  { %s354_s9 = smov 0   ;;  %s331_s10 = smov 0   ;;  %s368_s0 = inlined_call_operand.vmem [shape: f32[2,2,128], index: 0, kind: input, shape index: {}, may-alias: {0,2}]   ;;  %s369_s1 = inlined_call_operand.vmem [shape: f32[2,128], index: 1, kind: input, shape index: {}]   ;;  %s370_s2 = inlined_call_operand.vmem [shape: f32[2,2,128], index: 2, kind: output, shape index: {}, may-alias: {0,2}]  }
   0x1   :  { %s335_s11 = smov 0  }
   0x2 LB: > { %s21_s12 = sadd.s32 1, %s333_s10  ;;  %p286_p0 = scmp.ge.s32.totalorder %s337_s11, 1  ;;  %s337_s11 = sphi %s335_s11, %s12_s11   ;;  %s333_s10 = sphi %s331_s10, %s332_s10   ;;  %s329_s9 = sphi %s354_s9, %s371_s9  }
   0x3   : > { %p22_p1 = scmp.ge.s32.totalorder %s21_s12, 2  ;;  %p139_p2 = scmp.lt.s32.totalorder %s337_s11, 3 }
   0x5   : > { %s373_s12 = smov (%p22_p1, %s21_s12), 0  ;;  %p140_p3 = pnand %p286_p0, %p139_p2 }
   0x6   : > { %p169_p4 = scmp.lt.s32.totalorder (!%p140_p3), %s329_s9, 1 }
   0x7   : > { %143 = sbr.rel (%p140_p3) target bundleno = 19 (0x13), region = 28 }
   0xc   : > { %s375_s9 = smov (!%p169_p4, %s329_s9), 1  ;;  %v188_v0 = vld [vmem:[%s369_s1] sm:$0x3] }
   0xd   : > { %s287_s13 = sshll.u32 %s375_s9, 1 }
   0xe   : > { %s175_s18 = scalar_lea.vmem %s368_s0, %s287_s13  ;;  %s186_s21 = scalar_lea.vmem %s370_s2, %s287_s13 }
   0xf   : > { %v187_v1 = vld [vmem:[%s175_s18] sm:$0x3] }
  0x10   : > { %v189_v2 = vadd.f32 %v188_v0, %v187_v1 }
  0x12   : > { %190 = vst [vmem:[%s186_s21] sm:$0x3] %v189_v2 }
  0x13 PF: > { %s12_s11 = sadd.s32 1, %s337_s11   ;;  %s371_s9 = smov %s333_s10 }
  0x14   : > { %p9_p5 = scmp.ge.s32.totalorder %s12_s11, 4   ;;  %s332_s10 = smov %s373_s12  }
  0x16   :  { %11 = sbr.rel (!%p9_p5) target bundleno = 2 (0x2), region = 61 }

</bundles_post_ra>
